<compile_context>
chip_gen: v7x
topology: tpu7x:2x2x1
jax: 0.10.0
libtpu: 0.0.40
codegen_flags: <defaults>
</compile_context>

<pallas_src>
import functools

import jax
import jax.numpy as jnp
from jax.experimental import pallas as pl
from jax.experimental.pallas import tpu as pltpu


def _round_up(v, m):
    return ((v + m - 1) // m) * m


def _vmem_capacity_bytes():
    """Per-core VMEM capacity; conservative fallback if the query fails."""
    try:
        info = pltpu.get_tpu_info()
        for name in ("vmem_capacity_bytes", "vmem_size_bytes", "vmem_bytes"):
            v = getattr(info, name, None)
            if v:
                return int(v)
    except Exception:
        pass
    return 64 * 1024 * 1024  # v7x per-TensorCore size: safe on every generation


# --------------------------------------------------------------- kernels ----

def _linear_kernel_kresident(x_ref, w_ref, b_ref, o_ref):
    # Whole reduction dim in one tile: one MXU matmul, bias add rides the VPU.
    acc = jnp.dot(x_ref[...].astype(w_ref.dtype), w_ref[...],
                  preferred_element_type=jnp.float32)
    o_ref[...] = (acc + b_ref[...]).astype(o_ref.dtype)


def _linear_kernel_ktiled(x_ref, w_ref, b_ref, o_ref, acc_ref):
    # K is tiled (last grid axis, "arbitrary"): accumulate in f32 VMEM scratch.
    k = pl.program_id(2)

    @pl.when(k == 0)
    def _():
        acc_ref[...] = jnp.zeros_like(acc_ref)

    acc_ref[...] += jnp.dot(x_ref[...].astype(w_ref.dtype), w_ref[...],
                            preferred_element_type=jnp.float32)

    @pl.when(k == pl.num_programs(2) - 1)
    def _():
        o_ref[...] = (acc_ref[...] + b_ref[...]).astype(o_ref.dtype)


# ---------------------------------------------------------------- wrapper ---

def prepare_projection_params(weight, bias, *, compute_dtype=None):
    """Pad / lay out the Linear parameters ONCE (setup time, not per forward).

    weight: (input_dim, output_dim)  -- transpose of PyTorch Linear's weight.
    bias:   (output_dim,)
    Returns (weight_padded[K, Np], bias_padded[1, Np] f32, output_dim).
    """
    input_dim, output_dim = weight.shape
    n_pad = _round_up(output_dim, 128)  # lane-dense output -> unmasked vst
    if n_pad != output_dim:
        weight = jnp.pad(weight, ((0, 0), (0, n_pad - output_dim)))
        bias = jnp.pad(bias, (0, n_pad - output_dim))
    if compute_dtype is not None:
        weight = weight.astype(compute_dtype)  # opt-in bf16 MXU path
    bias = bias.reshape(1, n_pad).astype(jnp.float32)
    return weight, bias, output_dim


def projection_forward(x, weight_p, bias_p, output_dim, *,
                       tm_target=512, tn_cap=1024, interpret=False):
    """y = x @ W + b with pre-prepared (padded) parameters."""
    input_dim, n_pad = weight_p.shape
    assert x.shape[-1] == input_dim
    lead = x.shape[:-1]
    m = 1
    for d in lead:
        m *= int(d)
    x2d = x.reshape(m, input_dim)

    x_item = jnp.dtype(x.dtype).itemsize
    w_item = jnp.dtype(weight_p.dtype).itemsize
    o_item = x_item

    # ---- generation-aware VMEM budget ----
    vmem_cap = _vmem_capacity_bytes()
    vmem_limit = max(32 * 1024 * 1024, min((vmem_cap * 7) // 8, 112 * 1024 * 1024))
    budget = vmem_limit - 4 * 1024 * 1024  # headroom for compiler scratch

    # ---- K tile: only tile when it divides evenly, else keep K resident ----
    tk = input_dim
    if input_dim > 2048:
        for cand in (2048, 1024, 512, 256):
            if input_dim % cand == 0:
                tk = cand
                break
    grid_k = input_dim // tk
    k_tiled = grid_k > 1

    # ---- N tile (multiple of 128; ragged last block is masked) ----
    tn = min(n_pad, tn_cap)

    # ---- M tile: as big as the budget allows (sublane granularity) ----
    sub = max(8, 32 // x_item)
    tm = min(_round_up(tm_target, sub), _round_up(m, sub))

    def _footprint(tm_, tn_, tk_):
        # Pallas double-buffers every block-mapped operand (incl. the
        # "resident" weight) -> count 2x each, plus the f32 accumulator.
        return (2 * tm_ * tk_ * x_item          # activations
                + 2 * tk_ * tn_ * w_item        # weight
                + 2 * 8 * tn_ * 4               # bias (sublane-padded, tiny)
                + 2 * tm_ * tn_ * o_item        # output
                + (tm_ * tn_ * 4 if k_tiled else 0))

    while _footprint(tm, tn, tk) > budget and (tm > sub or tn > 128):
        if tm > sub:
            tm = max(_round_up(tm // 2, sub), sub)
        elif tn > 128:
            tn = max(_round_up(tn // 2, 128), 128)

    grid_m = pl.cdiv(m, tm)      # no M padding: ragged last block is masked
    grid_n = pl.cdiv(n_pad, tn)
    grid = (grid_m, grid_n, grid_k)

    # Megacore: only shard axes with >1 tile; sharding a 1-tile axis on v7x
    # just duplicates the resident-weight DMA into both cores' VMEM.
    dim_sem = ("parallel" if grid_m > 1 else "arbitrary",
               "parallel" if grid_n > 1 else "arbitrary",
               "arbitrary")

    in_specs = [
        pl.BlockSpec((tm, tk), lambda i, j, k: (i, k)),   # streamed activations
        pl.BlockSpec((tk, tn), lambda i, j, k: (k, j)),   # weight
        pl.BlockSpec((1, tn), lambda i, j, k: (0, j)),    # bias
    ]
    out_spec = pl.BlockSpec((tm, tn), lambda i, j, k: (i, j))

    kernel = _linear_kernel_ktiled if k_tiled else _linear_kernel_kresident
    scratch = (pltpu.VMEM((tm, tn), jnp.float32),) if k_tiled else ()

    cost = pl.CostEstimate(
        flops=2 * m * input_dim * n_pad,
        transcendentals=0,
        bytes_accessed=(m * input_dim * x_item + input_dim * n_pad * w_item
                        + n_pad * 4 + m * n_pad * o_item),
    )

    out2d = pl.pallas_call(
        kernel,
        out_shape=jax.ShapeDtypeStruct((m, n_pad), x.dtype),
        grid=grid,
        in_specs=in_specs,
        out_specs=out_spec,
        scratch_shapes=scratch,
        compiler_params=pltpu.CompilerParams(
            dimension_semantics=dim_sem,
            vmem_limit_bytes=int(vmem_limit),
        ),
        cost_estimate=cost,
        interpret=interpret,
    )(x2d, weight_p, bias_p)

    if n_pad != output_dim:
        out2d = out2d[:, :output_dim]
    return out2d.reshape(*lead, output_dim)


def projection_layer(x, weight, bias, *, compute_dtype=None):
    """One-shot convenience wrapper (pads params per call).

    For repeated forward passes, call prepare_projection_params once and reuse
    the result with projection_forward (avoids a per-call weight copy).
    """
    w_p, b_p, out_dim = prepare_projection_params(
        weight, bias, compute_dtype=compute_dtype)
    return projection_forward(x, w_p, b_p, out_dim)


if __name__ == "__main__":
    # Shapes implied by the module: x is (..., input_dim) -> (..., output_dim)
    batch, seq = 2, 8
    input_dim, output_dim = 32, 16

    key = jax.random.PRNGKey(0)
    kx, kw, kb = jax.random.split(key, 3)

    x = jax.random.normal(kx, (batch, seq, input_dim), dtype=jnp.float32)

    # Deterministic nn.Linear-style init: U(-1/sqrt(in), 1/sqrt(in))
    bound = 1.0 / (input_dim ** 0.5)
    weight = jax.random.uniform(
        kw, (input_dim, output_dim), jnp.float32, -bound, bound)
    bias = jax.random.uniform(kb, (output_dim,), jnp.float32, -bound, bound)

    # Pad / lay out parameters once (setup time), then run the kernel.
    w_p, b_p, out_dim = prepare_projection_params(weight, bias)
    fwd = jax.jit(functools.partial(projection_forward, output_dim=out_dim))

    y = fwd(x, w_p, b_p)
    y = jax.block_until_ready(y)

    # Correctness check against plain-JAX reference of the same math.
    y_ref = x @ weight + bias
    assert y.shape == (batch, seq, output_dim)
    assert jnp.allclose(y, y_ref, atol=1e-5, rtol=1e-5)

    print("KERNEL_OK")
</pallas_src>

<mosaic_0001>
module attributes {stable_mosaic.version = 11 : i64} {
  func.func @_linear_kernel_kresident(%arg0: i32, %arg1: i32, %arg2: i32, %arg3: memref<16x32xf32, #tpu.memory_space<vmem>>, %arg4: memref<32x128xf32, #tpu.memory_space<vmem>>, %arg5: memref<1x128xf32, #tpu.memory_space<vmem>>, %arg6: memref<16x128xf32, #tpu.memory_space<vmem>>) attributes {dimension_semantics = [#tpu.dimension_semantics<arbitrary>, #tpu.dimension_semantics<arbitrary>, #tpu.dimension_semantics<arbitrary>], iteration_bounds = array<i64: 1, 1, 1>, scalar_prefetch = 0 : i64, scratch_operands = 0 : i64, tpu.core_type = #tpu.core_type<tc>, window_params = [{transform_indices = @transform_0, window_bounds = array<i64: 16, 32>}, {transform_indices = @transform_1, window_bounds = array<i64: 32, 128>}, {transform_indices = @transform_2, window_bounds = array<i64: 1, 128>}, {transform_indices = @transform_3, window_bounds = array<i64: 16, 128>}]} {
    %c0 = arith.constant 0 : index
    %c0_0 = arith.constant 0 : index
    %0 = vector.load %arg3[%c0, %c0_0] : memref<16x32xf32, #tpu.memory_space<vmem>>, vector<16x32xf32>
    %c0_1 = arith.constant 0 : index
    %c0_2 = arith.constant 0 : index
    %1 = vector.load %arg4[%c0_1, %c0_2] : memref<32x128xf32, #tpu.memory_space<vmem>>, vector<32x128xf32>
    %cst = arith.constant dense<0.000000e+00> : vector<16x128xf32>
    %2 = tpu.matmul %0, %1, %cst {dimension_numbers = #tpu.dot_dimension_numbers<[1], [0], [0], [1], [0, 0, 1, 1], [], []>} : vector<16x32xf32>, vector<32x128xf32>, vector<16x128xf32> -> vector<16x128xf32>
    %c0_3 = arith.constant 0 : index
    %c0_4 = arith.constant 0 : index
    %3 = vector.load %arg5[%c0_3, %c0_4] : memref<1x128xf32, #tpu.memory_space<vmem>>, vector<1x128xf32>
    %4 = vector.broadcast %3 : vector<1x128xf32> to vector<16x128xf32>
    %5 = arith.addf %2, %4 : vector<16x128xf32>
    %c0_5 = arith.constant 0 : index
    %c0_6 = arith.constant 0 : index
    %6 = vector.load %arg6[%c0_5, %c0_6] : memref<16x128xf32, #tpu.memory_space<vmem>>, vector<16x128xf32>
    tpu.vector_store %arg6[%c0_5, %c0_6], %5 {strides = array<i32>} : memref<16x128xf32, #tpu.memory_space<vmem>>, vector<16x128xf32>,
    return
  }
  func.func @transform_0(%arg0: i32, %arg1: i32, %arg2: i32) -> (i32, i32) {
    %c0_i32 = arith.constant 0 : i32
    return %arg0, %arg2 : i32, i32
  }
  func.func @transform_1(%arg0: i32, %arg1: i32, %arg2: i32) -> (i32, i32) {
    %c0_i32 = arith.constant 0 : i32
    return %arg2, %arg1 : i32, i32
  }
  func.func @transform_2(%arg0: i32, %arg1: i32, %arg2: i32) -> (i32, i32) {
    %c0_i32 = arith.constant 0 : i32
    %c0_i32_0 = arith.constant 0 : i32
    return %c0_i32, %arg1 : i32, i32
  }
  func.func @transform_3(%arg0: i32, %arg1: i32, %arg2: i32) -> (i32, i32) {
    %c0_i32 = arith.constant 0 : i32
    return %arg0, %arg1 : i32, i32
  }
}

</mosaic_0001>

<bundles_post_ra>
// kernel: projection_forward.1
= control target key start
LH: loop header
LB: loop body
LE: loop exit
PB: predicated region body
PF: predicated region fallthrough
CT: control target
= control target key end

     0   :  { %8 = vsyncpa [#allocation3], 0  ;;  %s282_s0 = inlined_call_operand.hbm [shape: f32[16,32], index: 0, kind: input, shape index: {}]   ;;  %s283_s1 = inlined_call_operand.hbm [shape: f32[32,128], index: 1, kind: input, shape index: {}]   ;;  %s284_s2 = inlined_call_operand.vmem [shape: f32[1,128], index: 2, kind: input, shape index: {}]   ;;  %s285_s3 = inlined_call_operand.vmem [shape: f32[16,128], index: 3, kind: output, shape index: {}]  }
   0x1   :  { %9 = vsyncpa [#allocation5], 0  ;;  %s225_s12 = smov [#allocation2]   ;;  %s177_s16 = scalar_lea.hbm %s282_s0, 256 }
   0x2   :  { %s15_s13 = sshll.u32 %s225_s12, 4  ;;  %p178_p0 = scmp.ne.s32.totalorder %s282_s0, %s177_s16  ;;  %s16_s13 = int_to_ptr.vmem [resolvable:$true] %s15_s13 }
   0x3   :  { %p181_p1 = scmp.lt.u32.totalorder %s177_s16, %s282_s0 }
   0x5   :  { %p183_p2 = pnand %p181_p1, %p178_p0 }
   0x7   :  { %186 = shalt.err (!%p183_p2)
}
   0x8   :  { %s187_s21 = scalar_lea.vmem %s16_s13, 256  ;;  %p192_p4 = scmp.lt.s32.totalorder %s16_s13, %s16_s13 }
   0x9   :  { %p188_p3 = scmp.ne.s32.totalorder %s16_s13, %s187_s21  ;;  %p193_p5 = scmp.lt.s32.totalorder %s187_s21, %s187_s21 }
   0xb   :  { %p194_p6 = por %p193_p5, %p192_p4 }
   0xd   :  { %p195_p7 = pnand %p194_p6, %p188_p3 }
   0xf   :  { %198 = shalt.err (!%p195_p7)
}
  0x10   :  { %s226_s22 = smov 128   ;;  %s227_s23 = smov 8  }
  0x11   :  { %21 = dma.hbm_to_vmem [thread:$0]  %s282_s0, 256, %s16_s13, [#allocation3], %s226_s22, %s226_s22, %s227_s23  }
  0x12   :  { %s228_s26 = smov [#allocation4]   ;;  %s199_s30 = scalar_lea.hbm %s283_s1, 512 }
  0x13   :  { %s27_s27 = sshll.u32 %s228_s26, 4  ;;  %p200_p8 = scmp.ne.s32.totalorder %s283_s1, %s199_s30  ;;  %s28_s27 = int_to_ptr.vmem [resolvable:$true] %s27_s27 }
  0x14   :  { %p203_p9 = scmp.lt.u32.totalorder %s199_s30, %s283_s1 }
  0x16   :  { %p205_p10 = pnand %p203_p9, %p200_p8 }
  0x18   :  { %208 = shalt.err (!%p205_p10)
}
  0x19   :  { %s209_s8 = scalar_lea.vmem %s28_s27, 512  ;;  %p214_p12 = scmp.lt.s32.totalorder %s28_s27, %s28_s27 }
  0x1a   :  { %p210_p11 = scmp.ne.s32.totalorder %s28_s27, %s209_s8  ;;  %p215_p13 = scmp.lt.s32.totalorder %s209_s8, %s209_s8 }
  0x1c   :  { %p216_p0 = por %p215_p13, %p214_p12 }
  0x1e   :  { %p217_p1 = pnand %p216_p0, %p210_p11 }
  0x20   :  { %220 = shalt.err (!%p217_p1)
}
  0x21   :  { %33 = dma.hbm_to_vmem [thread:$0]  %s283_s1, 512, %s28_s27, [#allocation5], %s226_s22, %s226_s22, %s227_s23  }
  0x22   :  { %221 = dma.done.wait [#allocation3], 256  }
  0x23   :  { %222 = vsyncadd [#allocation3], 4294967040 }
  0x24   :  { %223 = dma.done.wait [#allocation5], 512  }
  0x25   :  { %224 = vsyncadd [#allocation5], 4294966784  ;;  %vm55_vm0 = vcmask 261120   ;;  %v44_v0 = vld [vmem:[#allocation4] sm:$0xff]  ;;  %v45_v1 = vld [vmem:[#allocation4 + $0x8] sm:$0xff] }
  0x26   :  { %v46_v2 = vld [vmem:[#allocation4 + $0x10] sm:$0xff]  ;;  %v165_v3 = vpack.c.bf16 %v45_v1, %v44_v0  ;;  %v47_v4 = vld [vmem:[#allocation4 + $0x18] sm:$0xff] }
  0x27   :  { %v42_v5 = vld [vmem:[#allocation2] sm:$0xff]  ;;  %v169_v6 = vpack.c.bf16 %v47_v4, %v46_v2  ;;  %v43_v7 = vld [vmem:[#allocation2 + $0x8] sm:$0xff] }
  0x28   :  { %162 = vmatprep.mubr.msk.f32.mxu0 %vm55_vm0, %v42_v5  ;;  %166 = vmatprep.subr.bf16.mxu0 %v165_v3  ;;  %v145_v8 = vld [vmem:[%s284_s2] ss:$0 sm:$0xff] }
  0x29   :  { %168 = vmatpush3.bf16.msra.mxu0 %v165_v3 }
  0x2a   :  { %170 = vmatprep.subr.bf16.mxu0 %v169_v6 }
  0x2d   :  { %172 = vmatpush3.bf16.msra.mxu0 %v169_v6 }
  0x30   :  { %163 = vmatmul.mubr.msk.f32.vlgmr.msra.gmra.mrb[0].mxu0 %vm55_vm0, %v43_v7 }
 0x103   :  { %v164_v9 = vpop.f32.mrb[0].mxu0 }
 0x104   :  { %v134_v10 = vadd.f32 %v164_v9, %v145_v8  ;;  %v128_v11 = vpop.f32.mrb[1].mxu0 }
 0x105   :  { %v129_v12 = vadd.f32 %v145_v8, %v128_v11 }
 0x106   :  { %138 = vst [vmem:[%s285_s3 + $0x8] sm:$0xff] %v134_v10 }
 0x107   :  { %137 = vst [vmem:[%s285_s3] sm:$0xff] %v129_v12 }
 0x108   :  { %143 = vsyncpa [#allocation3], 1 }
 0x109   :  { %144 = vsyncpa [#allocation5], 1 }

</bundles_post_ra>
